<compile_context>
chip_gen: v7x
topology: tpu7x:2x2x1
jax: 0.10.0
libtpu: 0.0.40
codegen_flags: <defaults>
</compile_context>

<pallas_src>
import functools

import jax
import jax.numpy as jnp
from jax.experimental import pallas as pl
from jax.experimental.pallas import tpu as pltpu


# ----------------------------- kernels --------------------------------------


def pool_sum_kernel(x_ref, sum_ref, acc_ref):
    """Per-channel spatial sums; grid axis 2 (HW tiles) is the reduction axis.

    Per-step work: VPU adds of 128-lane slices into a (t_c, 128) f32 scratch
    (co-issues under the tile DMA).  The cross-lane reduce and the lane-sparse
    (t_c, 1) output write happen once, in the last-step epilogue.
    """
    hi = pl.program_id(2)

    @pl.when(hi == 0)
    def _():
        acc_ref[...] = jnp.zeros_like(acc_ref)

    n_lane_tiles = x_ref.shape[2] // 128

    def body(j, carry):
        off = pl.multiple_of(j * 128, 128)
        acc_ref[...] += x_ref[0, :, pl.ds(off, 128)].astype(jnp.float32)
        return carry

    jax.lax.fori_loop(0, n_lane_tiles, body, 0)

    @pl.when(hi == pl.num_programs(2) - 1)
    def _():
        sum_ref[0] = jnp.sum(acc_ref[...], axis=-1, keepdims=True)


def residual_add_kernel(x_ref, se_ref, o_ref):
    """out = x + se, per-channel scalar broadcast across HW lanes, native dtype."""
    o_ref[...] = x_ref[...] + se_ref[...]


def fused_se_kernel(x_ref, w1_ref, b1_ref, w2_ref, b2_ref, o_ref):
    """Single-pass SE: pool + MLP + residual add with the (C, HW) slice resident.

    Column-vector MLP form (weights pre-transposed on the host), so the pooled
    mean, the hidden activation and `se` all live as (C, 1) columns and the
    broadcast over HW needs no lane<->sublane transpose.
    """
    hw = x_ref.shape[2]
    pooled = jnp.sum(x_ref[0].astype(jnp.float32), axis=-1, keepdims=True) * (1.0 / hw)
    pooled = pooled.astype(w1_ref.dtype)
    h = jnp.dot(w1_ref[...], pooled, preferred_element_type=jnp.float32) + b1_ref[...]
    h = jnp.maximum(h, 0.0)
    se = jnp.dot(w2_ref[...], h.astype(w2_ref.dtype),
                 preferred_element_type=jnp.float32) + b2_ref[...]
    o_ref[0] = x_ref[0] + se.astype(o_ref.dtype)


# ----------------------------- helpers --------------------------------------


def _pick_tile(dim, align, target):
    """Largest multiple of `align` that divides `dim` and is <= target; else full dim."""
    if dim % align != 0 or dim <= target:
        return dim
    t = (target // align) * align
    while t >= align:
        if dim % t == 0:
            return t
        t -= align
    return dim


def _round_up(x, m):
    return ((x + m - 1) // m) * m


def _vmem_budget_bytes():
    """~70% of this generation's physical VMEM (v7x: ~45 MiB, v5e/v6e: ~90 MiB).

    Falls back to a 64 MiB capacity assumption (the smallest, v7x) if the
    hardware query is unavailable.
    """
    try:
        cap = int(pltpu.get_tpu_info().vmem_capacity_bytes)
    except Exception:
        cap = 64 << 20
    return (cap * 7) // 10


def _mosaic_params(budget, semantics):
    return pltpu.CompilerParams(dimension_semantics=semantics,
                                vmem_limit_bytes=int(budget))


# ----------------------------- forward --------------------------------------


def se_bn_forward(x_nchw, p, eps=1e-5, *, fused=None, donate_input=False,
                  mlp_weight_dtype=None):
    B, C, H, W = x_nchw.shape
    HW = H * W
    Cout = p["w2"].shape[0]
    assert Cout == C, "residual add (input + x) requires outdim == dim"
    itemsize = x_nchw.dtype.itemsize
    f32 = jnp.float32
    budget = _vmem_budget_bytes()

    # SE-MLP weight dtype: bf16 when activations are bf16 or the CxC weights are
    # large enough that their DMA dominates the MLP; f32 otherwise (exact).
    if mlp_weight_dtype is None:
        mlp_weight_dtype = (jnp.bfloat16
                            if (x_nchw.dtype == jnp.bfloat16 or C >= 1024)
                            else jnp.float32)
    wbytes = jnp.dtype(mlp_weight_dtype).itemsize

    # ---- host-side parameter folding (eval-mode BN -> affine, 1x1 conv -> matmul)
    s1 = p["bn1_gamma"] / jnp.sqrt(p["bn1_var"] + eps)
    t1 = p["bn1_beta"] - p["bn1_mean"] * s1
    s2 = p["bn2_gamma"] / jnp.sqrt(p["bn2_var"] + eps)
    t2 = p["bn2_beta"] - p["bn2_mean"] * s2
    dw_scale = p["dw_w"] * s1                       # dwconv weight folded with BN1 scale
    dw_shift = p["dw_b"] * s1 + t1                  # dwconv bias folded with BN1 shift

    x3 = x_nchw.reshape(B, C, HW)                   # free reshape, NCHW-native

    # ---- dispatch: fused single-pass path if one batch slab + weights fit VMEM
    slab = C * HW * itemsize                        # per-batch (C, HW) block
    w_db = 2 * (C * C + Cout * C) * wbytes          # weights, double-buffered
    red_tmp = C * HW * 4 if itemsize < 4 else 0     # f32 reduce-temp headroom
    fused_need = 4 * slab + red_tmp + w_db + (2 << 20)
    use_fused = (fused_need <= budget) if fused is None else bool(fused)

    if use_fused:
        # Column-form folding: se_col = W2'' @ relu(W1'' @ pooled_col + b1'') + b2''
        w1c = (p["w1"] * dw_scale[None, :]).astype(mlp_weight_dtype)          # (C, C)
        b1c = (p["w1"] @ dw_shift + p["b1"]).astype(f32).reshape(C, 1)
        w2c = (p["w2"] * s2[None, :]).astype(mlp_weight_dtype)                # (Cout, C)
        b2c = (p["w2"] @ t2 + p["b2"]).astype(f32).reshape(Cout, 1)
        out3 = pl.pallas_call(
            fused_se_kernel,
            out_shape=jax.ShapeDtypeStruct((B, C, HW), x_nchw.dtype),
            grid_spec=pltpu.PrefetchScalarGridSpec(
                num_scalar_prefetch=0,
                grid=(B,),
                in_specs=[
                    pl.BlockSpec((1, C, HW), lambda b: (b, 0, 0)),
                    pl.BlockSpec((C, C), lambda b: (0, 0)),
                    pl.BlockSpec((C, 1), lambda b: (0, 0)),
                    pl.BlockSpec((Cout, C), lambda b: (0, 0)),
                    pl.BlockSpec((Cout, 1), lambda b: (0, 0)),
                ],
                out_specs=pl.BlockSpec((1, C, HW), lambda b: (b, 0, 0)),
            ),
            compiler_params=_mosaic_params(budget, ("parallel",)),
            input_output_aliases={0: 0} if donate_input else {},
        )(x3, w1c, b1c, w2c, b2c)
        return out3.reshape(B, C, H, W)

    # ---- 3-pass streaming path (large feature maps) -------------------------
    # Row-form MLP folding for pass 2 (run in plain jnp: negligible work).
    w1p = (dw_scale[:, None] * p["w1"].T).astype(mlp_weight_dtype)            # (C, C)
    b1p = (dw_shift @ p["w1"].T + p["b1"]).astype(f32).reshape(1, C)
    w2p = (s2[:, None] * p["w2"].T).astype(mlp_weight_dtype)                  # (C, Cout)
    b2p = (t2 @ p["w2"].T + p["b2"]).astype(f32).reshape(1, Cout)

    # Pad HW to a multiple of 128 (lane-dense tiles, no masked stores / VMEM
    # blow-up from full-HW fallback blocks).  Zeros are pool-neutral; the
    # padded output tail is sliced away.
    hw_pad = _round_up(HW, 128)
    if hw_pad != HW:
        x3 = jnp.pad(x3, ((0, 0), (0, 0), (0, hw_pad - HW)))

    # Tile sizes: the residual pass holds ~4 blocks (double-buffered in + out),
    # so size one block at ~(budget - margin)/4.  C tile aligned to the dtype's
    # sublane packing; keep >=2 parallel blocks for dual-TensorCore chips.
    block_target = max(1 << 20, (budget - (4 << 20)) // 4)
    c_align = max(8, 32 // itemsize)
    t_c = _pick_tile(C, c_align, 512)
    if B * (C // t_c) < 2 and (C // 2) >= c_align and (C // 2) % c_align == 0:
        t_c = _pick_tile(C, c_align, C // 2)
    t_hw_target = max(128, (block_target // max(t_c * itemsize, 1)) // 128 * 128)
    t_hw = _pick_tile(hw_pad, 128, t_hw_target)
    n_c, n_hw = C // t_c, hw_pad // t_hw

    # pass 1: per-channel spatial sums -> (B, C, 1) float32
    sums = pl.pallas_call(
        pool_sum_kernel,
        out_shape=jax.ShapeDtypeStruct((B, C, 1), jnp.float32),
        grid_spec=pltpu.PrefetchScalarGridSpec(
            num_scalar_prefetch=0,
            grid=(B, n_c, n_hw),
            in_specs=[pl.BlockSpec((1, t_c, t_hw), lambda b, ci, hi: (b, ci, hi))],
            out_specs=pl.BlockSpec((1, t_c, 1), lambda b, ci, hi: (b, ci, 0)),
            scratch_shapes=[pltpu.VMEM((t_c, 128), jnp.float32)],
        ),
        compiler_params=_mosaic_params(budget, ("parallel", "parallel", "arbitrary")),
    )(x3)

    # pass 2: SE MLP on (B, C) pooled means (plain jnp; tiny next to passes 1/3).
    # Normalise by the true HW in f32 *before* any downcast to the weight dtype.
    pooled = (sums[:, :, 0] * (1.0 / HW)).astype(mlp_weight_dtype)
    h = jnp.maximum(jnp.dot(pooled, w1p, preferred_element_type=f32) + b1p, 0.0)
    se = jnp.dot(h.astype(mlp_weight_dtype), w2p, preferred_element_type=f32) + b2p
    se3 = se.astype(x_nchw.dtype).reshape(B, Cout, 1)

    # pass 3: streaming residual broadcast-add (native dtype, lane-dense tiles)
    out3 = pl.pallas_call(
        residual_add_kernel,
        out_shape=jax.ShapeDtypeStruct((B, C, hw_pad), x_nchw.dtype),
        grid_spec=pltpu.PrefetchScalarGridSpec(
            num_scalar_prefetch=0,
            grid=(B, n_c, n_hw),
            in_specs=[
                pl.BlockSpec((1, t_c, t_hw), lambda b, ci, hi: (b, ci, hi)),
                pl.BlockSpec((1, t_c, 1), lambda b, ci, hi: (b, ci, 0)),
            ],
            out_specs=pl.BlockSpec((1, t_c, t_hw), lambda b, ci, hi: (b, ci, hi)),
        ),
        compiler_params=_mosaic_params(budget, ("parallel", "parallel", "parallel")),
        input_output_aliases={0: 0} if donate_input else {},
    )(x3, se3)

    if hw_pad != HW:
        out3 = out3[:, :, :HW]
    return out3.reshape(B, C, H, W)


# ----------------------------- reference & params ---------------------------


def init_params(key, dim, outdim):
    ks = jax.random.split(key, 6)
    p = {}
    # dwconv: weight (dim, 1, 1, 1) -> (dim,), bias (dim,)
    p["dw_w"] = jax.random.normal(ks[0], (dim,), jnp.float32) * 0.1 + 1.0
    p["dw_b"] = jax.random.normal(ks[1], (dim,), jnp.float32) * 0.1
    # norm (BatchNorm2d(dim), eval mode)
    p["bn1_gamma"] = jnp.linspace(0.8, 1.2, dim).astype(jnp.float32)
    p["bn1_beta"] = jnp.linspace(-0.1, 0.1, dim).astype(jnp.float32)
    p["bn1_mean"] = jnp.linspace(-0.05, 0.05, dim).astype(jnp.float32)
    p["bn1_var"] = jnp.linspace(0.9, 1.1, dim).astype(jnp.float32)
    # pwconv1: weight (dim, dim, 1, 1) -> (dim, dim), bias (dim,)
    p["w1"] = jax.random.normal(ks[2], (dim, dim), jnp.float32) * (1.0 / dim ** 0.5)
    p["b1"] = jax.random.normal(ks[3], (dim,), jnp.float32) * 0.1
    # grn (BatchNorm2d(dim), eval mode)
    p["bn2_gamma"] = jnp.linspace(1.1, 0.9, dim).astype(jnp.float32)
    p["bn2_beta"] = jnp.linspace(0.05, -0.05, dim).astype(jnp.float32)
    p["bn2_mean"] = jnp.linspace(0.02, -0.02, dim).astype(jnp.float32)
    p["bn2_var"] = jnp.linspace(1.05, 0.95, dim).astype(jnp.float32)
    # pwconv2: weight (outdim, dim, 1, 1) -> (outdim, dim), bias (outdim,)
    p["w2"] = jax.random.normal(ks[4], (outdim, dim), jnp.float32) * (1.0 / dim ** 0.5)
    p["b2"] = jax.random.normal(ks[5], (outdim,), jnp.float32) * 0.1
    return p


def se_bn_ref(x_nchw, p, eps=1e-5):
    """Pure-JAX reference mirroring the PyTorch forward (eval-mode BN)."""
    pooled = jnp.mean(x_nchw, axis=(2, 3))                      # (B, C)
    y = pooled * p["dw_w"][None, :] + p["dw_b"][None, :]
    s1 = p["bn1_gamma"] / jnp.sqrt(p["bn1_var"] + eps)
    t1 = p["bn1_beta"] - p["bn1_mean"] * s1
    y = y * s1 + t1
    y = y @ p["w1"].T + p["b1"]
    y = jnp.maximum(y, 0.0)
    s2 = p["bn2_gamma"] / jnp.sqrt(p["bn2_var"] + eps)
    t2 = p["bn2_beta"] - p["bn2_mean"] * s2
    y = y * s2 + t2
    y = y @ p["w2"].T + p["b2"]                                 # (B, Cout)
    return x_nchw + y[:, :, None, None]


# TODO(synk): training-mode BatchNorm (batch-stat computation + running-stat
# updates) is not implemented; eval-mode BN is folded into affine scale/shift.


if __name__ == "__main__":
    key = jax.random.PRNGKey(0)
    kx, kp, kx2 = jax.random.split(key, 3)

    # Case 1: small shape, auto dispatch (fused single-pass path).
    B, C, H, W = 2, 4, 16, 16
    x = jax.random.normal(kx, (B, C, H, W), jnp.float32)
    params = init_params(kp, dim=C, outdim=C)
    ref = se_bn_ref(x, params)

    out_fused = jax.block_until_ready(jax.jit(se_bn_forward)(x, params))
    assert out_fused.shape == ref.shape
    assert jnp.allclose(out_fused, ref, rtol=1e-5, atol=1e-5), "fused path mismatch"

    # Case 2: same inputs, forced 3-pass streaming path.
    fwd3 = jax.jit(functools.partial(se_bn_forward, fused=False))
    out_3pass = jax.block_until_ready(fwd3(x, params))
    assert jnp.allclose(out_3pass, ref, rtol=1e-5, atol=1e-5), "3-pass path mismatch"

    # Case 3: HW not a multiple of 128 (exercises host-side lane padding).
    B2, C2, H2, W2 = 1, 8, 10, 10
    x2 = jax.random.normal(kx2, (B2, C2, H2, W2), jnp.float32)
    params2 = init_params(kp, dim=C2, outdim=C2)
    ref2 = se_bn_ref(x2, params2)
    out_pad = jax.block_until_ready(fwd3(x2, params2))
    assert jnp.allclose(out_pad, ref2, rtol=1e-5, atol=1e-5), "padded-HW path mismatch"

    print("KERNEL_OK")
</pallas_src>

<mosaic_0001>
module attributes {stable_mosaic.version = 11 : i64} {
  func.func @fused_se_kernel(%arg0: i32, %arg1: memref<1x4x256xf32, #tpu.memory_space<vmem>>, %arg2: memref<4x4xf32, #tpu.memory_space<vmem>>, %arg3: memref<4x1xf32, #tpu.memory_space<vmem>>, %arg4: memref<4x4xf32, #tpu.memory_space<vmem>>, %arg5: memref<4x1xf32, #tpu.memory_space<vmem>>, %arg6: memref<1x4x256xf32, #tpu.memory_space<vmem>>) attributes {dimension_semantics = [#tpu.dimension_semantics<parallel>], iteration_bounds = array<i64: 2>, scalar_prefetch = 0 : i64, scratch_operands = 0 : i64, tpu.core_type = #tpu.core_type<tc>, window_params = [{transform_indices = @transform_0, window_bounds = array<i64: 1, 4, 256>}, {pipeline_mode = #tpu.pipeline_mode<synchronous>, transform_indices = @transform_1, window_bounds = array<i64: 4, 4>}, {pipeline_mode = #tpu.pipeline_mode<synchronous>, transform_indices = @transform_2, window_bounds = array<i64: 4, 1>}, {pipeline_mode = #tpu.pipeline_mode<synchronous>, transform_indices = @transform_3, window_bounds = array<i64: 4, 4>}, {pipeline_mode = #tpu.pipeline_mode<synchronous>, transform_indices = @transform_4, window_bounds = array<i64: 4, 1>}, {transform_indices = @transform_5, window_bounds = array<i64: 1, 4, 256>}]} {
    %c0 = arith.constant 0 : index
    %c0_0 = arith.constant 0 : index
    %c0_1 = arith.constant 0 : index
    %0 = vector.load %arg1[%c0, %c0_0, %c0_1] : memref<1x4x256xf32, #tpu.memory_space<vmem>>, vector<1x4x256xf32>
    %1 = vector.shape_cast %0 : vector<1x4x256xf32> to vector<4x256xf32>
    %cst = arith.constant dense<0.000000e+00> : vector<4xf32>
    %2 = vector.multi_reduction <add>, %1, %cst [1] : vector<4x256xf32> to vector<4xf32>
    %3 = vector.shape_cast %2 : vector<4xf32> to vector<4x1xf32>
    %cst_2 = arith.constant 3.906250e-03 : f32
    %4 = vector.broadcast %cst_2 : f32 to vector<4x1xf32>
    %5 = arith.mulf %3, %4 : vector<4x1xf32>
    %c0_3 = arith.constant 0 : index
    %c0_4 = arith.constant 0 : index
    %6 = vector.load %arg2[%c0_3, %c0_4] : memref<4x4xf32, #tpu.memory_space<vmem>>, vector<4x4xf32>
    %cst_5 = arith.constant dense<0.000000e+00> : vector<4x1xf32>
    %7 = tpu.matmul %6, %5, %cst_5 {dimension_numbers = #tpu.dot_dimension_numbers<[1], [0], [0], [1], [0, 0, 1, 1], [], []>} : vector<4x4xf32>, vector<4x1xf32>, vector<4x1xf32> -> vector<4x1xf32>
    %c0_6 = arith.constant 0 : index
    %c0_7 = arith.constant 0 : index
    %8 = vector.load %arg3[%c0_6, %c0_7] : memref<4x1xf32, #tpu.memory_space<vmem>>, vector<4x1xf32>
    %9 = arith.addf %7, %8 : vector<4x1xf32>
    %cst_8 = arith.constant 0.000000e+00 : f32
    %10 = vector.broadcast %cst_8 : f32 to vector<4x1xf32>
    %11 = arith.maximumf %9, %10 : vector<4x1xf32>
    %c0_9 = arith.constant 0 : index
    %c0_10 = arith.constant 0 : index
    %12 = vector.load %arg4[%c0_9, %c0_10] : memref<4x4xf32, #tpu.memory_space<vmem>>, vector<4x4xf32>
    %cst_11 = arith.constant dense<0.000000e+00> : vector<4x1xf32>
    %13 = tpu.matmul %12, %11, %cst_11 {dimension_numbers = #tpu.dot_dimension_numbers<[1], [0], [0], [1], [0, 0, 1, 1], [], []>} : vector<4x4xf32>, vector<4x1xf32>, vector<4x1xf32> -> vector<4x1xf32>
    %c0_12 = arith.constant 0 : index
    %c0_13 = arith.constant 0 : index
    %14 = vector.load %arg5[%c0_12, %c0_13] : memref<4x1xf32, #tpu.memory_space<vmem>>, vector<4x1xf32>
    %15 = arith.addf %13, %14 : vector<4x1xf32>
    %c0_14 = arith.constant 0 : index
    %c0_15 = arith.constant 0 : index
    %c0_16 = arith.constant 0 : index
    %16 = vector.load %arg1[%c0_14, %c0_15, %c0_16] : memref<1x4x256xf32, #tpu.memory_space<vmem>>, vector<1x4x256xf32>
    %17 = vector.shape_cast %16 : vector<1x4x256xf32> to vector<4x256xf32>
    %18 = vector.broadcast %15 : vector<4x1xf32> to vector<4x256xf32>
    %19 = arith.addf %17, %18 : vector<4x256xf32>
    %c0_17 = arith.constant 0 : index
    %c0_18 = arith.constant 0 : index
    %c0_19 = arith.constant 0 : index
    %20 = vector.load %arg6[%c0_17, %c0_18, %c0_19] : memref<1x4x256xf32, #tpu.memory_space<vmem>>, vector<1x4x256xf32>
    %21 = vector.shape_cast %20 : vector<1x4x256xf32> to vector<4x256xf32>
    %22 = vector.shape_cast %19 : vector<4x256xf32> to vector<1x4x256xf32>
    tpu.vector_store %arg6[%c0_17, %c0_18, %c0_19], %22 {strides = array<i32>} : memref<1x4x256xf32, #tpu.memory_space<vmem>>, vector<1x4x256xf32>,
    return
  }
  func.func @transform_0(%arg0: i32) -> (i32, i32, i32) {
    %c0_i32 = arith.constant 0 : i32
    %c0_i32_0 = arith.constant 0 : i32
    %c0_i32_1 = arith.constant 0 : i32
    return %arg0, %c0_i32, %c0_i32_0 : i32, i32, i32
  }
  func.func @transform_1(%arg0: i32) -> (i32, i32) {
    %c0_i32 = arith.constant 0 : i32
    %c0_i32_0 = arith.constant 0 : i32
    %c0_i32_1 = arith.constant 0 : i32
    return %c0_i32, %c0_i32_0 : i32, i32
  }
  func.func @transform_2(%arg0: i32) -> (i32, i32) {
    %c0_i32 = arith.constant 0 : i32
    %c0_i32_0 = arith.constant 0 : i32
    %c0_i32_1 = arith.constant 0 : i32
    return %c0_i32, %c0_i32_0 : i32, i32
  }
  func.func @transform_3(%arg0: i32) -> (i32, i32) {
    %c0_i32 = arith.constant 0 : i32
    %c0_i32_0 = arith.constant 0 : i32
    %c0_i32_1 = arith.constant 0 : i32
    return %c0_i32, %c0_i32_0 : i32, i32
  }
  func.func @transform_4(%arg0: i32) -> (i32, i32) {
    %c0_i32 = arith.constant 0 : i32
    %c0_i32_0 = arith.constant 0 : i32
    %c0_i32_1 = arith.constant 0 : i32
    return %c0_i32, %c0_i32_0 : i32, i32
  }
  func.func @transform_5(%arg0: i32) -> (i32, i32, i32) {
    %c0_i32 = arith.constant 0 : i32
    %c0_i32_0 = arith.constant 0 : i32
    %c0_i32_1 = arith.constant 0 : i32
    return %arg0, %c0_i32, %c0_i32_0 : i32, i32, i32
  }
}

</mosaic_0001>

<bundles_post_ra>
// kernel: se_bn_forward.1
= control target key start
LH: loop header
LB: loop body
LE: loop exit
PB: predicated region body
PF: predicated region fallthrough
CT: control target
= control target key end

     0   :  { %s550_s18 = smov 0   ;;  %s590_s0 = inlined_call_operand.vmem [shape: f32[2,4,256], index: 0, kind: input, shape index: {}]   ;;  %s591_s1 = inlined_call_operand.vmem [shape: f32[4,4], index: 1, kind: input, shape index: {}]   ;;  %s592_s2 = inlined_call_operand.vmem [shape: f32[4,1], index: 2, kind: input, shape index: {}]   ;;  %s593_s3 = inlined_call_operand.vmem [shape: f32[4,4], index: 3, kind: input, shape index: {}]   ;;  %s594_s4 = inlined_call_operand.vmem [shape: f32[4,1], index: 4, kind: input, shape index: {}]   ;;  %s595_s5 = inlined_call_operand.vmem [shape: f32[2,4,256], index: 5, kind: output, shape index: {}]  }
   0x1 LB: > { %s463_s19 = sadd.s32 4294967295, %s514_s18   ;;  %p467_p0 = scmp.ge.s32.totalorder %s514_s18, 1  ;;  %s514_s18 = sphi %s550_s18, %s15_s18  }
   0x2   : > { %p187_p1 = scmp.lt.s32.totalorder %s514_s18, 3 }
   0x4   : > { %p188_p2 = pnand %p467_p0, %p187_p1 }
   0x5   : > { %p215_p3 = scmp.lt.s32.totalorder (!%p188_p2), %s463_s19, 1  ;;  %vm229_vm0 = vcmask (!%p188_p2), 1043456   ;;  %v516_v5 = vmov (!%p188_p2), 0.0   ;;  %vm517_vm1 = vmmov (!%p188_p2), 0   ;;  %v236_v8 = vld [vmem:[%s591_s1] sm:$0xf] (!%p188_p2)  ;;  %v401_v22 = vlaneseq (!%p188_p2) }
   0x6   : > { %191 = sbr.rel (%p188_p2) target bundleno = 731 (0x2db), region = 40  ;;  %484 = vmatprep.subr.mxu0 (!%p188_p2), %v516_v5  ;;  %489 = vmatprep.subr.mxu1 (!%p188_p2), %v516_v5  ;;  %vm238_vm2 = vcmask (!%p188_p2), 31744   ;;  %v237_v9 = vld [vmem:[%s592_s2] sm:$0xf] (!%p188_p2)  ;;  %v518_v15 = vmov (!%p188_p2), 0  }
   0x7   : > { %486 = vmatprep.mubr.msk.f32.mxu0 (!%p188_p2), %vm517_vm1, %v516_v5  ;;  %491 = vmatprep.mubr.msk.f32.mxu1 (!%p188_p2), %vm517_vm1, %v516_v5  ;;  %v316_v14 = vld [vmem:[%s593_s3] sm:$0xf] (!%p188_p2)  ;;  %v519_v20 = vmov (!%p188_p2), 839922192   ;;  %v402_v24 = vshrl.u32 (!%p188_p2), %v401_v22, 7 }
   0x8   : > { %506 = vset.pattern.permute.xlu0 (!%p188_p2), %v518_v15  ;;  %v317_v16 = vld [vmem:[%s594_s4] sm:$0xf] (!%p188_p2)  ;;  %v399_v21 = vunpack.c.l.s4 (!%p188_p2), %v519_v20 }
   0xa   : > { %v400_v23 = vunpack.c.0.s8 (!%p188_p2), %v399_v21 }
   0xc   : > { %v403_v25 = vsub.s32 (!%p188_p2), %v400_v23, %v402_v24 }
   0xd   : > { %s597_s19 = smov (!%p215_p3, %s463_s19), 1 }
   0xe   : > { %s478_s20 = sshll.u32 %s597_s19, 3 }
   0xf   : > { %s219_s23 = scalar_lea.vmem %s590_s0, %s478_s20  ;;  %s224_s9 = scalar_lea.vmem %s595_s5, %s478_s20 }
  0x10   : > { %v225_v0 = vld [vmem:[%s219_s23] sm:$0xff] }
  0x11   : > { %v227_v1 = vcombine.high %v225_v0, %v225_v0  ;;  %v230_v2 = vsel %vm229_vm0, %v225_v0, 0.0 }
  0x13   : > { %v231_v3 = vsel %vm229_vm0, %v227_v1, 0.0 }
  0x14   : > { %v232_v4 = vadd.f32 %v231_v3, %v230_v2 }
  0x16   : > { %233 = vadd.xlane.f32.xlu0 %v232_v4 }
  0xa3   : > { %v234_v6 = vpop.xlane.xlu0 %233 }
  0xa4   : > { %v235_v7 = vmul.f32 0.00390625, %v234_v6 }
  0xa6   : > { %485 = vmatpush3.msk.msra.mxu0 %vm229_vm0, %v235_v7 }
  0xa7   : > { %487 = vmatmul.mubr.msk.f32.vlgmr.msra.gmra.mrb[0].mxu0 %vm238_vm2, %v236_v8 }
 0x17a   : > { %v311_v10 = vpop.f32.mrb[0].mxu0 }
 0x17b   : > { %v312_v11 = vadd.f32 %v311_v10, %v237_v9  ;;  %v488_v12 = vpop.f32.mrb[1].mxu0 }
 0x17d   : > { %v315_v13 = vmax.f32 %v312_v11, 0.0 }
 0x17f   : > { %490 = vmatpush3.msk.msra.mxu1 %vm229_vm0, %v315_v13 }
 0x180   : > { %492 = vmatmul.mubr.msk.f32.vlgmr.msra.gmra.mrb[0].mxu1 %vm238_vm2, %v316_v14 }
 0x253   : > { %v390_v17 = vpop.f32.mrb[0].mxu1 }
 0x254   : > { %v391_v18 = vadd.f32 %v390_v17, %v317_v16  ;;  %v493_v19 = vpop.f32.mrb[1].mxu1 }
 0x256   : > { %396 = vperm.xlu0 %506, %v391_v18  }
 0x2d5   : > { %v397_v26 = vpop.permute.xlu0 %396 }
 0x2d6   : > { %v404_v27 = vrot.slane %v397_v26, %v403_v25 }
 0x2d8   : > { %v406_v28 = vadd.f32 %v404_v27, %v225_v0 }
 0x2da   : > { %407 = vst [vmem:[%s224_s9] sm:$0xff] %v406_v28 }
 0x2db PF: > { %s15_s18 = sadd.s32 1, %s514_s18  }
 0x2dc   : > { %p12_p4 = scmp.ge.s32.totalorder %s15_s18, 4  }
 0x2de   :  { %14 = sbr.rel (!%p12_p4) target bundleno = 1 (0x1), region = 70 }

</bundles_post_ra>
